<compile_context>
chip_gen: v7x
topology: tpu7x:2x2x1
jax: 0.10.0
libtpu: 0.0.40
codegen_flags: <defaults>
</compile_context>

<pallas_src>
import jax
import jax.numpy as jnp
from jax import lax
from jax.experimental import pallas as pl
from jax.experimental.pallas import tpu as pltpu


def _round_up(a, b):
    return (a + b - 1) // b * b


def _make_mmd_kernel(tn, n_real, batch_size, kernel_num, use_squaring):
    """Kernel body with static shape/hyperparameter closure.

    Per (i, j) tile it computes the (tm, tn) multi-bandwidth Gaussian kernel
    block and accumulates its contribution to (K @ s)[i*tm:(i+1)*tm].
    """

    def kernel(neg_inv_bw_ref, a_ref, b_ref, o_ref):
        j = pl.program_id(1)

        # Output row-block is resident across the j (accumulation) axis.
        @pl.when(j == 0)
        def _init():
            o_ref[...] = jnp.zeros_like(o_ref)

        a = a_ref[...]                      # (tm, d), native dtype -> MXU
        b = b_ref[...]                      # (tn, d)
        a32 = a.astype(jnp.float32)
        b32 = b.astype(jnp.float32)
        d = b.shape[1]

        # Pairwise squared L2 distances for this tile:
        #   l2[p,q] = ||a_p||^2 + ||b_q||^2 - 2 a_p.b_q
        gram = lax.dot_general(a, b, (((1,), (1,)), ((), ())),
                               preferred_element_type=jnp.float32)      # (tm,tn)
        sq_a = jnp.sum(a32 * a32, axis=1, keepdims=True)                # (tm,1)
        # Lane-oriented ||b_q||^2 via a tiny MXU matvec (avoids a transpose).
        sq_b = lax.dot_general(jnp.ones((1, d), jnp.float32), b32 * b32,
                               (((1,), (1,)), ((), ())),
                               preferred_element_type=jnp.float32)      # (1,tn)
        l2 = jnp.maximum(sq_a + sq_b - 2.0 * gram, 0.0)

        if use_squaring:
            # kernel_mul == 2: one exp for the LARGEST bandwidth, then
            # repeated squaring builds the remaining kernels on the VPU.
            e = jnp.exp(l2 * neg_inv_bw_ref[kernel_num - 1])
            kval = e
            p = e
            for _ in range(kernel_num - 1):
                p = p * p
                kval = kval + p
        else:
            # Generic fallback: one scalar multiply + one exp per bandwidth
            # (still no per-element divides).
            kval = jnp.exp(l2 * neg_inv_bw_ref[0])
            for i in range(1, kernel_num):
                kval = kval + jnp.exp(l2 * neg_inv_bw_ref[i])

        # Column signs (+1 source, -1 target, 0 padding) built from iota.
        col = j * tn + lax.broadcasted_iota(jnp.int32, (1, tn), 1)
        s_col = jnp.where(col < batch_size, 1.0,
                          jnp.where(col < n_real, -1.0, 0.0)).astype(jnp.float32)

        # Accumulate this tile's contribution to (K @ s) for the row block.
        o_ref[...] += jnp.sum(kval * s_col, axis=1, keepdims=True)

    return kernel


def mmd_loss_pallas(total, batch_size, kernel_mul=2.0, kernel_num=5,
                    block_size=256):
    """MMD loss over total = concat([source, target]) of shape (2B, D).

    block_size: 256 is a good default on v6e/v7x; use 128 on v5e.
    """
    n, d = total.shape
    assert n == 2 * batch_size

    # --- Closed-form bandwidth (O(n*d)); matches sum of diff-based L2. ---
    x32 = total.astype(jnp.float32)
    sum_sq = jnp.sum(x32 * x32)
    col_sum = jnp.sum(x32, axis=0)
    sum_l2 = jnp.maximum(2.0 * n * sum_sq - 2.0 * jnp.sum(col_sum * col_sum), 0.0)
    bandwidth = sum_l2 / float(n * n - n)
    bandwidth = bandwidth / (kernel_mul ** (kernel_num // 2))
    bw_list = jnp.stack([bandwidth * (kernel_mul ** i) for i in range(kernel_num)])
    neg_inv_bw = (-1.0 / (bw_list + 1e-8)).astype(jnp.float32)   # (kernel_num,)

    # --- Tiling: tm/tn multiples of 8; single full block for small n. ---
    n_min = _round_up(n, 8)
    if n_min <= block_size:
        tm = tn = n_min
    else:
        tm = tn = block_size
    n_pad = _round_up(n, tm)
    gm, gn = n_pad // tm, n_pad // tn

    x_pad = jnp.pad(total, ((0, n_pad - n), (0, 0)))   # zero rows get weight 0

    # Repeated-squaring exp trick is exact (up to the 1e-8 eps placement)
    # only for kernel_mul == 2; fall back to the generic loop otherwise.
    use_squaring = (kernel_num >= 1) and abs(float(kernel_mul) - 2.0) < 1e-12

    kernel = _make_mmd_kernel(tn, n, batch_size, kernel_num, use_squaring)

    itemsize = x_pad.dtype.itemsize
    vmem_est = int(2 * (tm + tn) * d * itemsize + 8 * tm * tn * 4 + (4 << 20))
    vmem_limit = int(min(64 * 1024 * 1024, max(32 * 1024 * 1024, vmem_est)))

    n_work = gm * gn * tm * tn
    cost = pl.CostEstimate(
        flops=int(2 * n_work * d + 12 * n_work),
        transcendentals=int((1 if use_squaring else kernel_num) * n_work),
        bytes_accessed=int(gm * gn * (tm + tn) * d * itemsize + 2 * n_pad * 4),
    )

    ks = pl.pallas_call(
        kernel,
        out_shape=jax.ShapeDtypeStruct((n_pad, 1), jnp.float32),
        grid=(gm, gn),
        in_specs=[
            pl.BlockSpec(memory_space=pltpu.MemorySpace.SMEM),   # neg_inv_bw scalars
            pl.BlockSpec((tm, d), lambda i, j: (i, 0)),          # row tile of x
            pl.BlockSpec((tn, d), lambda i, j: (j, 0)),          # col tile of x
        ],
        out_specs=pl.BlockSpec((tm, 1), lambda i, j: (i, 0)),    # (K @ s) rows
        compiler_params=pltpu.CompilerParams(
            dimension_semantics=("parallel", "arbitrary"),
            vmem_limit_bytes=vmem_limit,
        ),
        cost_estimate=cost,
    )(neg_inv_bw, x_pad, x_pad)

    # loss = s^T (K s) / B^2 with s = [+1]*B + [-1]*B + [0]*padding.
    idx = jnp.arange(n_pad)
    s = jnp.where(idx < batch_size, 1.0,
                  jnp.where(idx < n, -1.0, 0.0)).astype(jnp.float32)
    return jnp.dot(ks[:, 0], s) / float(batch_size * batch_size)


def binary_mmd_loss(batch_pred, batch_group, kernel_mul=2.0, kernel_num=5,
                    block_size=256):
    # Glue: data-dependent split by group (dynamic shapes -> eager JAX).
    idx0 = jnp.where(batch_group == 0)[0]
    idx1 = jnp.where(batch_group == 1)[0]
    group_pred_0 = batch_pred[idx0]
    group_pred_1 = batch_pred[idx1]

    min_len = int(min(group_pred_0.shape[0], group_pred_1.shape[0]))
    if min_len == 0:
        raise ValueError("BinaryMMDLoss: one of the groups is empty.")
    source = group_pred_0[:min_len]
    target = group_pred_1[:min_len]
    total = jnp.concatenate([source, target], axis=0)   # (2B, D)

    return mmd_loss_pallas(total, min_len, kernel_mul, kernel_num, block_size)


def _reference_mmd(batch_pred, batch_group, kernel_mul=2.0, kernel_num=5):
    """Pure-JAX reference mirroring the PyTorch module, for validation."""
    idx0 = jnp.where(batch_group == 0)[0]
    idx1 = jnp.where(batch_group == 1)[0]
    g0 = batch_pred[idx0]
    g1 = batch_pred[idx1]
    min_len = int(min(g0.shape[0], g1.shape[0]))
    source, target = g0[:min_len], g1[:min_len]
    total = jnp.concatenate([source, target], axis=0)
    n = total.shape[0]
    diff = total[None, :, :] - total[:, None, :]
    l2 = jnp.sum(diff ** 2, axis=2)
    bandwidth = jnp.sum(l2) / (n * n - n)
    bandwidth = bandwidth / (kernel_mul ** (kernel_num // 2))
    kval = sum(jnp.exp(-l2 / (bandwidth * kernel_mul ** i + 1e-8))
               for i in range(kernel_num))
    B = min_len
    XX = kval[:B, :B]
    YY = kval[B:, B:]
    XY = kval[:B, B:]
    YX = kval[B:, :B]
    return jnp.mean(XX + YY - XY - YX)


if __name__ == "__main__":
    key = jax.random.PRNGKey(0)
    k1, k2 = jax.random.split(key)

    # Test 1: tiny single-tile case (grid = (1, 1)).
    N1, D1 = 8, 16
    pred1 = jax.random.normal(k1, (N1, D1), dtype=jnp.float32)
    group1 = jnp.array([0, 1, 0, 1, 0, 1, 0, 1], dtype=jnp.int32)
    loss1 = jax.block_until_ready(binary_mmd_loss(pred1, group1))
    ref1 = jax.block_until_ready(_reference_mmd(pred1, group1))
    assert jnp.allclose(loss1, ref1, rtol=2e-4, atol=2e-5), (loss1, ref1)

    # Test 2: multi-tile grid (4x4), row padding and unequal group sizes.
    N2, D2 = 64, 32
    pred2 = jax.random.normal(k2, (N2, D2), dtype=jnp.float32)
    group2 = jnp.concatenate([jnp.zeros((30,), jnp.int32),
                              jnp.ones((34,), jnp.int32)])
    loss2 = jax.block_until_ready(binary_mmd_loss(pred2, group2, block_size=16))
    ref2 = jax.block_until_ready(_reference_mmd(pred2, group2))
    assert jnp.allclose(loss2, ref2, rtol=2e-4, atol=2e-5), (loss2, ref2)

    print("KERNEL_OK")
</pallas_src>

<mosaic_0001>
module attributes {stable_mosaic.version = 11 : i64} {
  func.func @kernel(%arg0: i32, %arg1: i32, %arg2: memref<5xf32, #tpu.memory_space<smem>>, %arg3: memref<8x16xf32, #tpu.memory_space<vmem>>, %arg4: memref<8x16xf32, #tpu.memory_space<vmem>>, %arg5: memref<8x1xf32, #tpu.memory_space<vmem>>) attributes {dimension_semantics = [#tpu.dimension_semantics<parallel>, #tpu.dimension_semantics<arbitrary>], iteration_bounds = array<i64: 1, 1>, scalar_prefetch = 0 : i64, scratch_operands = 0 : i64, tpu.core_type = #tpu.core_type<tc>, window_params = [{transform_indices = @transform_0, window_bounds = array<i64: 5>}, {transform_indices = @transform_1, window_bounds = array<i64: 8, 16>}, {transform_indices = @transform_2, window_bounds = array<i64: 8, 16>}, {transform_indices = @transform_3, window_bounds = array<i64: 8, 1>}]} {
    %c0_i32 = arith.constant 0 : i32
    %0 = arith.cmpi eq, %arg1, %c0_i32 : i32
    %1 = arith.extui %0 : i1 to i32
    %c0_i32_0 = arith.constant 0 : i32
    %2 = arith.cmpi ne, %1, %c0_i32_0 : i32
    scf.if %2 {
      %cst_18 = arith.constant 0.000000e+00 : f32
      %52 = vector.broadcast %cst_18 : f32 to vector<8x1xf32>
      %c0_19 = arith.constant 0 : index
      %c0_20 = arith.constant 0 : index
      %53 = vector.load %arg5[%c0_19, %c0_20] : memref<8x1xf32, #tpu.memory_space<vmem>>, vector<8x1xf32>
      tpu.vector_store %arg5[%c0_19, %c0_20], %52 {strides = array<i32>} : memref<8x1xf32, #tpu.memory_space<vmem>>, vector<8x1xf32>,
    } else {
    }
    %c0 = arith.constant 0 : index
    %c0_1 = arith.constant 0 : index
    %3 = vector.load %arg3[%c0, %c0_1] : memref<8x16xf32, #tpu.memory_space<vmem>>, vector<8x16xf32>
    %c0_2 = arith.constant 0 : index
    %c0_3 = arith.constant 0 : index
    %4 = vector.load %arg4[%c0_2, %c0_3] : memref<8x16xf32, #tpu.memory_space<vmem>>, vector<8x16xf32>
    %cst = arith.constant dense<0.000000e+00> : vector<8x8xf32>
    %5 = tpu.matmul %3, %4, %cst {dimension_numbers = #tpu.dot_dimension_numbers<[1], [1], [0], [0], [0, 0, 1, 0], [], []>} : vector<8x16xf32>, vector<8x16xf32>, vector<8x8xf32> -> vector<8x8xf32>
    %6 = arith.mulf %3, %3 : vector<8x16xf32>
    %cst_4 = arith.constant dense<0.000000e+00> : vector<8xf32>
    %7 = vector.multi_reduction <add>, %6, %cst_4 [1] : vector<8x16xf32> to vector<8xf32>
    %8 = vector.shape_cast %7 : vector<8xf32> to vector<8x1xf32>
    %cst_5 = arith.constant 1.000000e+00 : f32
    %9 = vector.broadcast %cst_5 : f32 to vector<1x16xf32>
    %10 = arith.mulf %4, %4 : vector<8x16xf32>
    %cst_6 = arith.constant dense<0.000000e+00> : vector<1x8xf32>
    %11 = tpu.matmul %9, %10, %cst_6 {dimension_numbers = #tpu.dot_dimension_numbers<[1], [1], [0], [0], [0, 0, 1, 0], [], []>} : vector<1x16xf32>, vector<8x16xf32>, vector<1x8xf32> -> vector<1x8xf32>
    %12 = vector.broadcast %8 : vector<8x1xf32> to vector<8x8xf32>
    %13 = vector.broadcast %11 : vector<1x8xf32> to vector<8x8xf32>
    %14 = arith.addf %12, %13 : vector<8x8xf32>
    %cst_7 = arith.constant 2.000000e+00 : f32
    %15 = vector.broadcast %cst_7 : f32 to vector<8x8xf32>
    %16 = arith.mulf %15, %5 : vector<8x8xf32>
    %17 = arith.subf %14, %16 : vector<8x8xf32>
    %cst_8 = arith.constant 0.000000e+00 : f32
    %18 = vector.broadcast %cst_8 : f32 to vector<8x8xf32>
    %19 = arith.maximumf %17, %18 : vector<8x8xf32>
    %c4 = arith.constant 4 : index
    %20 = memref.load %arg2[%c4] : memref<5xf32, #tpu.memory_space<smem>>
    %21 = vector.broadcast %20 : f32 to vector<8x8xf32>
    %22 = arith.mulf %19, %21 : vector<8x8xf32>
    %23 = math.exp %22 : vector<8x8xf32>
    %24 = arith.mulf %23, %23 : vector<8x8xf32>
    %25 = arith.addf %23, %24 : vector<8x8xf32>
    %26 = arith.mulf %24, %24 : vector<8x8xf32>
    %27 = arith.addf %25, %26 : vector<8x8xf32>
    %28 = arith.mulf %26, %26 : vector<8x8xf32>
    %29 = arith.addf %27, %28 : vector<8x8xf32>
    %30 = arith.mulf %28, %28 : vector<8x8xf32>
    %31 = arith.addf %29, %30 : vector<8x8xf32>
    %c8_i32 = arith.constant 8 : i32
    %32 = arith.muli %arg1, %c8_i32 : i32
    %33 = tpu.iota {dimensions = array<i32: 1>} : vector<1x8xi32>
    %34 = vector.broadcast %32 : i32 to vector<1x8xi32>
    %35 = arith.addi %34, %33 : vector<1x8xi32>
    %c4_i32 = arith.constant 4 : i32
    %36 = vector.broadcast %c4_i32 : i32 to vector<1x8xi32>
    %37 = arith.cmpi slt, %35, %36 : vector<1x8xi32>
    %c8_i32_9 = arith.constant 8 : i32
    %38 = vector.broadcast %c8_i32_9 : i32 to vector<1x8xi32>
    %39 = arith.cmpi slt, %35, %38 : vector<1x8xi32>
    %cst_10 = arith.constant -1.000000e+00 : f32
    %cst_11 = arith.constant 0.000000e+00 : f32
    %40 = vector.broadcast %cst_10 : f32 to vector<1x8xf32>
    %41 = vector.broadcast %cst_11 : f32 to vector<1x8xf32>
    %42 = arith.select %39, %40, %41 : vector<1x8xi1>, vector<1x8xf32>
    %cst_12 = arith.constant 1.000000e+00 : f32
    %43 = vector.broadcast %cst_12 : f32 to vector<1x8xf32>
    %44 = arith.select %37, %43, %42 : vector<1x8xi1>, vector<1x8xf32>
    %c0_13 = arith.constant 0 : index
    %c0_14 = arith.constant 0 : index
    %45 = vector.load %arg5[%c0_13, %c0_14] : memref<8x1xf32, #tpu.memory_space<vmem>>, vector<8x1xf32>
    %46 = vector.broadcast %44 : vector<1x8xf32> to vector<8x8xf32>
    %47 = arith.mulf %31, %46 : vector<8x8xf32>
    %cst_15 = arith.constant dense<0.000000e+00> : vector<8xf32>
    %48 = vector.multi_reduction <add>, %47, %cst_15 [1] : vector<8x8xf32> to vector<8xf32>
    %49 = vector.shape_cast %48 : vector<8xf32> to vector<8x1xf32>
    %50 = arith.addf %45, %49 : vector<8x1xf32>
    %c0_16 = arith.constant 0 : index
    %c0_17 = arith.constant 0 : index
    %51 = vector.load %arg5[%c0_16, %c0_17] : memref<8x1xf32, #tpu.memory_space<vmem>>, vector<8x1xf32>
    tpu.vector_store %arg5[%c0_16, %c0_17], %50 {strides = array<i32>} : memref<8x1xf32, #tpu.memory_space<vmem>>, vector<8x1xf32>,
    return
  }
  func.func @transform_0(%arg0: i32, %arg1: i32) -> i32 {
    %c0_i32 = arith.constant 0 : i32
    %c0_i32_0 = arith.constant 0 : i32
    return %c0_i32 : i32
  }
  func.func @transform_1(%arg0: i32, %arg1: i32) -> (i32, i32) {
    %c0_i32 = arith.constant 0 : i32
    %c0_i32_0 = arith.constant 0 : i32
    return %arg0, %c0_i32 : i32, i32
  }
  func.func @transform_2(%arg0: i32, %arg1: i32) -> (i32, i32) {
    %c0_i32 = arith.constant 0 : i32
    %c0_i32_0 = arith.constant 0 : i32
    return %arg1, %c0_i32 : i32, i32
  }
  func.func @transform_3(%arg0: i32, %arg1: i32) -> (i32, i32) {
    %c0_i32 = arith.constant 0 : i32
    %c0_i32_0 = arith.constant 0 : i32
    return %arg0, %c0_i32 : i32, i32
  }
}

</mosaic_0001>

<bundles_post_ra>
// kernel: tpu_custom_call.1
= control target key start
LH: loop header
LB: loop body
LE: loop exit
PB: predicated region body
PF: predicated region fallthrough
CT: control target
= control target key end

     0   :  { %8 = vsyncpa [#allocation4], 0  ;;  %s424_s0 = inlined_call_operand.hbm [shape: f32[5], index: 0, kind: input, shape index: {}]   ;;  %s425_s1 = inlined_call_operand.hbm [shape: f32[8,16], index: 1, kind: input, shape index: {}]   ;;  %s426_s2 = inlined_call_operand.hbm [shape: f32[8,16], index: 2, kind: input, shape index: {}]   ;;  %s427_s3 = inlined_call_operand.vmem [shape: f32[8,1], index: 3, kind: output, shape index: {}]  }
   0x1   :  { %9 = vsyncpa [#allocation3], 0 }
   0x2   :  { %10 = vsyncpa [#allocation7], 0  ;;  %s288_s14 = scalar_lea.hbm %s424_s0, 16 }
   0x3   :  { %p289_p0 = scmp.ne.s32.totalorder %s424_s0, %s288_s14  ;;  %p292_p1 = scmp.lt.u32.totalorder %s288_s14, %s424_s0 }
   0x5   :  { %p294_p2 = pnand %p292_p1, %p289_p0 }
   0x7   :  { %297 = shalt.err (!%p294_p2)
}
   0x8   :  { %s348_s19 = smov [#allocation2]   ;;  %s349_s22 = smov [#allocation5]  }
   0x9   :  { %18 = dma.hbm_to_smem %s424_s0, 16, %s348_s19, [#allocation4]  }
   0xa   :  { %s25_s23 = sshll.u32 %s349_s22, 4  ;;  %s350_s24 = smov [#allocation6]   ;;  %s26_s23 = int_to_ptr.vmem [resolvable:$true] %s25_s23 }
   0xb   :  { %s35_s25 = sshll.u32 %s350_s24, 4  ;;  %s298_s28 = scalar_lea.hbm %s425_s1, 128  ;;  %s36_s25 = int_to_ptr.vmem [resolvable:$true] %s35_s25 }
   0xc   :  { %p299_p3 = scmp.ne.s32.totalorder %s425_s1, %s298_s28  ;;  %p302_p4 = scmp.lt.u32.totalorder %s298_s28, %s425_s1 }
   0xe   :  { %p304_p5 = pnand %p302_p4, %p299_p3 }
  0x10   :  { %307 = shalt.err (!%p304_p5)
}
  0x11   :  { %s308_s0 = scalar_lea.vmem %s26_s23, 128  ;;  %p313_p7 = scmp.lt.s32.totalorder %s26_s23, %s26_s23 }
  0x12   :  { %p309_p6 = scmp.ne.s32.totalorder %s26_s23, %s308_s0  ;;  %p314_p8 = scmp.lt.s32.totalorder %s308_s0, %s308_s0 }
  0x14   :  { %p315_p9 = por %p314_p8, %p313_p7 }
  0x16   :  { %p316_p10 = pnand %p315_p9, %p309_p6 }
  0x18   :  { %319 = shalt.err (!%p316_p10)
}
  0x19   :  { %28 = dma.hbm_to_vmem [thread:$0]  %s425_s1, 128, %s26_s23, [#allocation3]  }
  0x1a   :  { %s320_s10 = scalar_lea.hbm %s426_s2, 128 }
  0x1b   :  { %p321_p11 = scmp.ne.s32.totalorder %s426_s2, %s320_s10  ;;  %p324_p12 = scmp.lt.u32.totalorder %s320_s10, %s426_s2 }
  0x1d   :  { %p326_p13 = pnand %p324_p12, %p321_p11 }
  0x1f   :  { %329 = shalt.err (!%p326_p13)
}
  0x20   :  { %s330_s15 = scalar_lea.vmem %s36_s25, 128  ;;  %p335_p1 = scmp.lt.s32.totalorder %s36_s25, %s36_s25 }
  0x21   :  { %p331_p0 = scmp.ne.s32.totalorder %s36_s25, %s330_s15  ;;  %p336_p2 = scmp.lt.s32.totalorder %s330_s15, %s330_s15 }
  0x23   :  { %p337_p3 = por %p336_p2, %p335_p1 }
  0x25   :  { %p338_p4 = pnand %p337_p3, %p331_p0 }
  0x27   :  { %341 = shalt.err (!%p338_p4)
}
  0x28   :  { %38 = dma.hbm_to_vmem [thread:$0]  %s426_s2, 128, %s36_s25, [#allocation7]  }
  0x29   :  { %342 = dma.done.wait [#allocation4], 16  }
  0x2a   :  { %343 = vsyncadd [#allocation4], 4294967280 }
  0x2b   :  { %344 = dma.done.wait [#allocation3], 128  }
  0x2c   :  { %345 = vsyncadd [#allocation3], 4294967168 }
  0x2d   :  { %346 = dma.done.wait [#allocation7], 128  }
  0x2e   :  { %347 = vsyncadd [#allocation7], 4294967168 }
  0x2f   :  { %48 = sfence }
  0x30   :  { %v56_v0 = vld [vmem:[#allocation6] sm:$0xff]  ;;  %vm57_vm0 = vcmask 130048   ;;  %v55_v1 = vld [vmem:[#allocation5] sm:$0xff]  ;;  %v351_v2 = vmov 0.0   ;;  %vm352_vm1 = vmmov 0   ;;  %v353_v6 = vmov 1.0  }
  0x31   :  { %275 = vmatprep.subr.mxu1 %v351_v2  ;;  %270 = vmatprep.subr.mxu0 %v351_v2  ;;  %v138_v3 = vmul.f32 %v56_v0, %v56_v0  ;;  %v134_v4 = vmul.f32 %v55_v1, %v55_v1  ;;  %v215_v7 = vlaneseq  ;;  %s265_s2 = sld [smem:[#allocation2 + $0x4]]  ;;  %vm247_vm4 = vcmask 64512  }
  0x32   :  { %271 = vmatpush3.xpose.msk.msra.mxu0 %vm57_vm0, %v56_v0  ;;  %277 = vmatprep.mubr.msk.f32.mxu1 %vm352_vm1, %v351_v2  ;;  %vm53_vm5 = vcmask 7168  }
  0x33   :  { %276 = vmatpush3.xpose.msk.msra.mxu1 %vm57_vm0, %v138_v3  ;;  %272 = vmatprep.mubr.msk.f32.mxu0 %vm352_vm1, %v351_v2  ;;  %v135_v5 = vsel %vm57_vm0, %v134_v4, 0.0  ;;  %v216_v8 = vshrl.u32 %v215_v7, 7  ;;  %v238_v23 = vand.u32 127, %v215_v7  ;;  %54 = vst.msk [vmem:[%s427_s3] sm:$0xff] %vm53_vm5, %v351_v2 }
  0x34   :  { %136 = vadd.xlane.f32.xlu0 %v135_v5 }
  0x35   :  { %273 = vmatmul.mubr.msk.f32.vlgmr.msra.gmra.mrb[0].mxu0 %vm57_vm0, %v55_v1  ;;  %v217_v9 = vsub.s32 0, %v216_v8  ;;  %vm242_vm2 = vcmp.lt.s32.totalorder %v238_v23, 8  ;;  %vm241_vm3 = vcmp.lt.s32.totalorder %v238_v23, 4 }
  0x36   :  { %278 = vmatmul.mubr.msk.f32.vlgmr.msra.gmra.mrb[0].mxu1 %vm57_vm0, %v353_v6  ;;  %v243_v30 = vsel %vm242_vm2, -1.0, %v351_v2 }
  0x37   :  { %v224_v19 = vstv %s265_s2  ;;  %v244_v33 = vsel %vm241_vm3, 1.0, %v243_v30 }
  0x3a   :  { %v245_v37 = vld [vmem:[%s427_s3] sm:$0xff] }
  0xc1   :  { %v137_v11 = vpop.xlane.xlu0 %136 }
 0x108   :  { %v130_v10 = vpop.f32.mrb[0].mxu0 }
 0x109   :  { %v211_v12 = vpop.f32.mrb[0].mxu1  ;;  %v274_v13 = vpop.f32.mrb[1].mxu0  ;;  %v220_v15 = vmul.f32 2.0, %v130_v10 }
 0x10a   :  { %v218_v14 = vrot.slane %v211_v12, %v217_v9  ;;  %v279_v16 = vpop.f32.mrb[1].mxu1 }
 0x10c   :  { %v219_v17 = vadd.f32 %v218_v14, %v137_v11 }
 0x10e   :  { %v221_v18 = vsub.f32 %v219_v17, %v220_v15 }
 0x110   :  { %v222_v20 = vmax.f32 %v221_v18, 0.0 }
 0x112   :  { %v225_v21 = vmul.f32 %v224_v19, %v222_v20 }
 0x114   :  { %v226_v22 = vmul.f32 1.442695, %v225_v21 }
 0x116   :  { %286 = vpow2.f32 %v226_v22 }
 0x120   :  { %v287_v24 = vpop.eup %286 }
 0x121   :  { %v228_v25 = vmul.f32 %v287_v24, %v287_v24 }
 0x123   :  { %v229_v26 = vadd.f32 %v287_v24, %v228_v25  ;;  %v230_v27 = vmul.f32 %v228_v25, %v228_v25 }
 0x125   :  { %v231_v28 = vadd.f32 %v230_v27, %v229_v26  ;;  %v232_v29 = vmul.f32 %v230_v27, %v230_v27 }
 0x127   :  { %v233_v31 = vadd.f32 %v232_v29, %v231_v28  ;;  %v234_v32 = vmul.f32 %v232_v29, %v232_v29 }
 0x129   :  { %v235_v34 = vadd.f32 %v234_v32, %v233_v31 }
 0x12b   :  { %v246_v35 = vmul.f32 %v244_v33, %v235_v34 }
 0x12d   :  { %v248_v36 = vsel %vm247_vm4, %v246_v35, 0.0 }
 0x12e   :  { %249 = vadd.xlane.f32.xlu0 %v248_v36 }
 0x1bb   :  { %v250_v38 = vpop.xlane.xlu0 %249 }
 0x1bc   :  { %v251_v39 = vadd.f32 %v250_v38, %v245_v37 }
 0x1be   :  { %253 = vst.msk [vmem:[%s427_s3] sm:$0xff] %vm53_vm5, %v251_v39 }
 0x1bf   :  { %258 = vsyncpa [#allocation3], 1 }
 0x1c0   :  { %259 = vsyncpa [#allocation7], 1 }
 0x1c1   :  { %260 = vsyncpa [#allocation4], 1 }

</bundles_post_ra>
